<compile_context>
chip_gen: v5e
topology: v5e:2x2
jax: 0.10.0
libtpu: 0.0.40
codegen_flags: <defaults>
</compile_context>

<pallas_src>
import functools

import jax
import jax.numpy as jnp
from jax.experimental import pallas as pl
from jax.experimental.pallas import tpu as pltpu


def dfi_conv_kernel(x_ref, w_ref, b_ref, o_ref, *, wpad, lv):
    """One grid step: 3x3 conv over a lane-flattened slab of images.

    x_ref: (Cin, L_blk)   bf16  zero-padded images, spatially flattened, batch
                                folded into the lane axis (stride Sp_pad/image)
    w_ref: (9, Cout, Cin) bf16  conv taps, tap index t = kh*3 + kw
    b_ref: (Cout, 1)      f32   bias
    o_ref: (Cout, L_blk)  f32   column j = img*Sp_pad + h*(W+2) + w holds out(h, w)
    """
    cout, l_blk = o_ref.shape

    # Deterministic tail: the last (l_blk - lv) columns are per-image pad that
    # the wrapper discards.  Full-width unmasked store, then overwrite valid part.
    o_ref[...] = jnp.zeros(o_ref.shape, o_ref.dtype)

    # In-kernel im2col: tap (kh, kw) of output column j is simply the input
    # column j + kh*(W+2) + kw of the same flattened slab (halo-free because
    # valid columns never read past their own image's padded footprint).
    acc = jnp.zeros((cout, lv), dtype=jnp.float32)
    for t in range(9):
        kh, kw = divmod(t, 3)
        off = kh * wpad + kw                       # static lane offset of this tap
        acc = acc + jnp.dot(w_ref[t], x_ref[:, pl.ds(off, lv)],
                            preferred_element_type=jnp.float32)

    o_ref[:, pl.ds(0, lv)] = (acc + b_ref[...]).astype(o_ref.dtype)


def dfi_block_forward(x_nchw, w_oihw, bias):
    """Forward pass of DFIBlock. x_nchw: (N, Cin, H, W) -> (N, 2, H, W)."""
    N, Cin, H, W = x_nchw.shape
    Cout = w_oihw.shape[0]
    Hp, Wp = H + 2, W + 2
    Sp = Hp * Wp                                   # flattened padded image
    Sp_pad = ((Sp + 127) // 128) * 128             # per-image lane stride (mult. of 128)
    maxoff = 2 * Wp + 2                            # largest tap offset (kh = kw = 2)

    # ---- wrapper glue on raw-size data (no 9x im2col materialization) ------
    xb = jnp.transpose(x_nchw.astype(jnp.bfloat16), (1, 0, 2, 3))   # (Cin,N,H,W)
    xb = jnp.pad(xb, ((0, 0), (0, 0), (1, 1), (1, 1)))              # (Cin,N,Hp,Wp)
    xb = xb.reshape(Cin, N, Sp)
    xb = jnp.pad(xb, ((0, 0), (0, 0), (0, Sp_pad - Sp)))            # (Cin,N,Sp_pad)
    xflat = xb.reshape(Cin, N * Sp_pad)

    # OIHW -> (kh, kw, O, I) -> (9, Cout, Cin); tap index t = kh*3 + kw.
    w_taps = jnp.transpose(w_oihw, (2, 3, 0, 1)).reshape(9, Cout, Cin)
    w_taps = w_taps.astype(jnp.bfloat16)
    b2d = bias.reshape(Cout, 1).astype(jnp.float32)

    # ---- images per grid step ----------------------------------------------
    # One step when everything fits (single-core v5e/v6e: grid is a serial loop);
    # >= 2 "parallel" image-aligned blocks when there is real work (v7x megacore)
    # or when the double-buffered block would blow the VMEM budget.
    bytes_per_img = Sp_pad * (4 * Cin + 8 * Cout)          # 2x-buffered in + out
    cap = max(1, (4 * 1024 * 1024) // bytes_per_img)
    if N * Sp_pad >= (1 << 15):                            # enough lanes for 2 TCs
        cap = min(cap, max(1, N // 2))
    B_img = max(d for d in range(1, N + 1) if N % d == 0 and d <= cap)
    num_blocks = N // B_img
    L_blk = B_img * Sp_pad
    L_total = N * Sp_pad
    lv = L_blk - maxoff                                    # valid columns per block

    kernel = functools.partial(dfi_conv_kernel, wpad=Wp, lv=lv)
    out_flat = pl.pallas_call(
        kernel,
        out_shape=jax.ShapeDtypeStruct((Cout, L_total), jnp.float32),
        grid_spec=pltpu.PrefetchScalarGridSpec(
            num_scalar_prefetch=0,
            grid=(num_blocks,),
            in_specs=[
                pl.BlockSpec((Cin, L_blk), lambda i: (0, i)),
                pl.BlockSpec((9, Cout, Cin), lambda i: (0, 0, 0)),
                pl.BlockSpec((Cout, 1), lambda i: (0, 0)),
            ],
            out_specs=pl.BlockSpec((Cout, L_blk), lambda i: (0, i)),
        ),
        compiler_params=pltpu.CompilerParams(
            dimension_semantics=("parallel",)),
        cost_estimate=pl.CostEstimate(
            flops=2 * Cout * 9 * Cin * N * H * W,
            transcendentals=0,
            bytes_accessed=(xflat.size * 2 + w_taps.size * 2 + b2d.size * 4
                            + Cout * L_total * 4)),
    )(xflat, w_taps, b2d)

    # (Cout, N*Sp_pad) -> (N, Cout, H, W): strip per-image lane pad + spatial pad.
    out = out_flat.reshape(Cout, N, Sp_pad)[:, :, :Sp]
    out = out.reshape(Cout, N, Hp, Wp)[:, :, :H, :W]
    return jnp.transpose(out, (1, 0, 2, 3))


if __name__ == "__main__":
    key = jax.random.PRNGKey(0)
    kx, kw = jax.random.split(key)

    # Small shapes consistent with the module.
    N, Cin, H, W = 2, 4, 16, 16
    Cout = 2

    x = jax.random.normal(kx, (N, Cin, H, W), dtype=jnp.float32)

    # Deterministic parameter init mirroring the PyTorch __init__:
    #   conv.weight ~ Normal(0, 1e-5), shape (2, in_channels, 3, 3); bias = 0.
    w = 1e-5 * jax.random.normal(kw, (Cout, Cin, 3, 3), dtype=jnp.float32)
    b = jnp.zeros((Cout,), dtype=jnp.float32)

    out = jax.block_until_ready(jax.jit(dfi_block_forward)(x, w, b))

    # Cross-check against XLA's native conv (same semantics as nn.Conv2d pad=1).
    ref = jax.lax.conv_general_dilated(
        x, w, window_strides=(1, 1), padding=((1, 1), (1, 1)),
        dimension_numbers=("NCHW", "OIHW", "NCHW"),
    ) + b.reshape(1, Cout, 1, 1)
    assert out.shape == (N, Cout, H, W)
    assert jnp.allclose(out, ref, atol=1e-5, rtol=1e-3), \
        float(jnp.max(jnp.abs(out - ref)))

    print("KERNEL_OK")
</pallas_src>

<mosaic_0001>
module attributes {stable_mosaic.version = 11 : i64} {
  func.func @dfi_conv_kernel(%arg0: i32, %arg1: memref<4x768xbf16, #tpu.memory_space<vmem>>, %arg2: memref<9x2x4xbf16, #tpu.memory_space<vmem>>, %arg3: memref<2x1xf32, #tpu.memory_space<vmem>>, %arg4: memref<2x768xf32, #tpu.memory_space<vmem>>) attributes {dimension_semantics = [#tpu.dimension_semantics<parallel>], iteration_bounds = array<i64: 1>, scalar_prefetch = 0 : i64, scratch_operands = 0 : i64, tpu.core_type = #tpu.core_type<tc>, window_params = [{transform_indices = @transform_0, window_bounds = array<i64: 4, 768>}, {pipeline_mode = #tpu.pipeline_mode<synchronous>, transform_indices = @transform_1, window_bounds = array<i64: 9, 2, 4>}, {pipeline_mode = #tpu.pipeline_mode<synchronous>, transform_indices = @transform_2, window_bounds = array<i64: 2, 1>}, {transform_indices = @transform_3, window_bounds = array<i64: 2, 768>}]} {
    %cst = arith.constant 0.000000e+00 : f32
    %0 = vector.broadcast %cst : f32 to vector<2x768xf32>
    %c0 = arith.constant 0 : index
    %c0_0 = arith.constant 0 : index
    %1 = vector.load %arg4[%c0, %c0_0] : memref<2x768xf32, #tpu.memory_space<vmem>>, vector<2x768xf32>
    tpu.vector_store %arg4[%c0, %c0_0], %0 {strides = array<i32>} : memref<2x768xf32, #tpu.memory_space<vmem>>, vector<2x768xf32>,
    %cst_1 = arith.constant 0.000000e+00 : f32
    %2 = vector.broadcast %cst_1 : f32 to vector<2x730xf32>
    %c0_2 = arith.constant 0 : index
    %c0_3 = arith.constant 0 : index
    %c0_4 = arith.constant 0 : index
    %3 = vector.load %arg2[%c0_2, %c0_3, %c0_4] : memref<9x2x4xbf16, #tpu.memory_space<vmem>>, vector<1x2x4xbf16>
    %4 = vector.shape_cast %3 : vector<1x2x4xbf16> to vector<2x4xbf16>
    %c0_5 = arith.constant 0 : index
    %c0_6 = arith.constant 0 : index
    %5 = vector.load %arg1[%c0_5, %c0_6] : memref<4x768xbf16, #tpu.memory_space<vmem>>, vector<4x730xbf16>
    %cst_7 = arith.constant dense<0.000000e+00> : vector<2x730xf32>
    %6 = tpu.matmul %4, %5, %cst_7 {dimension_numbers = #tpu.dot_dimension_numbers<[1], [0], [0], [1], [0, 0, 1, 1], [], []>} : vector<2x4xbf16>, vector<4x730xbf16>, vector<2x730xf32> -> vector<2x730xf32>
    %7 = arith.addf %2, %6 : vector<2x730xf32>
    %c1 = arith.constant 1 : index
    %c0_8 = arith.constant 0 : index
    %c0_9 = arith.constant 0 : index
    %8 = vector.load %arg2[%c1, %c0_8, %c0_9] : memref<9x2x4xbf16, #tpu.memory_space<vmem>>, vector<1x2x4xbf16>
    %9 = vector.shape_cast %8 : vector<1x2x4xbf16> to vector<2x4xbf16>
    %c0_10 = arith.constant 0 : index
    %c1_11 = arith.constant 1 : index
    %10 = vector.load %arg1[%c0_10, %c1_11] : memref<4x768xbf16, #tpu.memory_space<vmem>>, vector<4x730xbf16>
    %cst_12 = arith.constant dense<0.000000e+00> : vector<2x730xf32>
    %11 = tpu.matmul %9, %10, %cst_12 {dimension_numbers = #tpu.dot_dimension_numbers<[1], [0], [0], [1], [0, 0, 1, 1], [], []>} : vector<2x4xbf16>, vector<4x730xbf16>, vector<2x730xf32> -> vector<2x730xf32>
    %12 = arith.addf %7, %11 : vector<2x730xf32>
    %c2 = arith.constant 2 : index
    %c0_13 = arith.constant 0 : index
    %c0_14 = arith.constant 0 : index
    %13 = vector.load %arg2[%c2, %c0_13, %c0_14] : memref<9x2x4xbf16, #tpu.memory_space<vmem>>, vector<1x2x4xbf16>
    %14 = vector.shape_cast %13 : vector<1x2x4xbf16> to vector<2x4xbf16>
    %c0_15 = arith.constant 0 : index
    %c2_16 = arith.constant 2 : index
    %15 = vector.load %arg1[%c0_15, %c2_16] : memref<4x768xbf16, #tpu.memory_space<vmem>>, vector<4x730xbf16>
    %cst_17 = arith.constant dense<0.000000e+00> : vector<2x730xf32>
    %16 = tpu.matmul %14, %15, %cst_17 {dimension_numbers = #tpu.dot_dimension_numbers<[1], [0], [0], [1], [0, 0, 1, 1], [], []>} : vector<2x4xbf16>, vector<4x730xbf16>, vector<2x730xf32> -> vector<2x730xf32>
    %17 = arith.addf %12, %16 : vector<2x730xf32>
    %c3 = arith.constant 3 : index
    %c0_18 = arith.constant 0 : index
    %c0_19 = arith.constant 0 : index
    %18 = vector.load %arg2[%c3, %c0_18, %c0_19] : memref<9x2x4xbf16, #tpu.memory_space<vmem>>, vector<1x2x4xbf16>
    %19 = vector.shape_cast %18 : vector<1x2x4xbf16> to vector<2x4xbf16>
    %c0_20 = arith.constant 0 : index
    %c18 = arith.constant 18 : index
    %20 = vector.load %arg1[%c0_20, %c18] : memref<4x768xbf16, #tpu.memory_space<vmem>>, vector<4x730xbf16>
    %cst_21 = arith.constant dense<0.000000e+00> : vector<2x730xf32>
    %21 = tpu.matmul %19, %20, %cst_21 {dimension_numbers = #tpu.dot_dimension_numbers<[1], [0], [0], [1], [0, 0, 1, 1], [], []>} : vector<2x4xbf16>, vector<4x730xbf16>, vector<2x730xf32> -> vector<2x730xf32>
    %22 = arith.addf %17, %21 : vector<2x730xf32>
    %c4 = arith.constant 4 : index
    %c0_22 = arith.constant 0 : index
    %c0_23 = arith.constant 0 : index
    %23 = vector.load %arg2[%c4, %c0_22, %c0_23] : memref<9x2x4xbf16, #tpu.memory_space<vmem>>, vector<1x2x4xbf16>
    %24 = vector.shape_cast %23 : vector<1x2x4xbf16> to vector<2x4xbf16>
    %c0_24 = arith.constant 0 : index
    %c19 = arith.constant 19 : index
    %25 = vector.load %arg1[%c0_24, %c19] : memref<4x768xbf16, #tpu.memory_space<vmem>>, vector<4x730xbf16>
    %cst_25 = arith.constant dense<0.000000e+00> : vector<2x730xf32>
    %26 = tpu.matmul %24, %25, %cst_25 {dimension_numbers = #tpu.dot_dimension_numbers<[1], [0], [0], [1], [0, 0, 1, 1], [], []>} : vector<2x4xbf16>, vector<4x730xbf16>, vector<2x730xf32> -> vector<2x730xf32>
    %27 = arith.addf %22, %26 : vector<2x730xf32>
    %c5 = arith.constant 5 : index
    %c0_26 = arith.constant 0 : index
    %c0_27 = arith.constant 0 : index
    %28 = vector.load %arg2[%c5, %c0_26, %c0_27] : memref<9x2x4xbf16, #tpu.memory_space<vmem>>, vector<1x2x4xbf16>
    %29 = vector.shape_cast %28 : vector<1x2x4xbf16> to vector<2x4xbf16>
    %c0_28 = arith.constant 0 : index
    %c20 = arith.constant 20 : index
    %30 = vector.load %arg1[%c0_28, %c20] : memref<4x768xbf16, #tpu.memory_space<vmem>>, vector<4x730xbf16>
    %cst_29 = arith.constant dense<0.000000e+00> : vector<2x730xf32>
    %31 = tpu.matmul %29, %30, %cst_29 {dimension_numbers = #tpu.dot_dimension_numbers<[1], [0], [0], [1], [0, 0, 1, 1], [], []>} : vector<2x4xbf16>, vector<4x730xbf16>, vector<2x730xf32> -> vector<2x730xf32>
    %32 = arith.addf %27, %31 : vector<2x730xf32>
    %c6 = arith.constant 6 : index
    %c0_30 = arith.constant 0 : index
    %c0_31 = arith.constant 0 : index
    %33 = vector.load %arg2[%c6, %c0_30, %c0_31] : memref<9x2x4xbf16, #tpu.memory_space<vmem>>, vector<1x2x4xbf16>
    %34 = vector.shape_cast %33 : vector<1x2x4xbf16> to vector<2x4xbf16>
    %c0_32 = arith.constant 0 : index
    %c36 = arith.constant 36 : index
    %35 = vector.load %arg1[%c0_32, %c36] : memref<4x768xbf16, #tpu.memory_space<vmem>>, vector<4x730xbf16>
    %cst_33 = arith.constant dense<0.000000e+00> : vector<2x730xf32>
    %36 = tpu.matmul %34, %35, %cst_33 {dimension_numbers = #tpu.dot_dimension_numbers<[1], [0], [0], [1], [0, 0, 1, 1], [], []>} : vector<2x4xbf16>, vector<4x730xbf16>, vector<2x730xf32> -> vector<2x730xf32>
    %37 = arith.addf %32, %36 : vector<2x730xf32>
    %c7 = arith.constant 7 : index
    %c0_34 = arith.constant 0 : index
    %c0_35 = arith.constant 0 : index
    %38 = vector.load %arg2[%c7, %c0_34, %c0_35] : memref<9x2x4xbf16, #tpu.memory_space<vmem>>, vector<1x2x4xbf16>
    %39 = vector.shape_cast %38 : vector<1x2x4xbf16> to vector<2x4xbf16>
    %c0_36 = arith.constant 0 : index
    %c37 = arith.constant 37 : index
    %40 = vector.load %arg1[%c0_36, %c37] : memref<4x768xbf16, #tpu.memory_space<vmem>>, vector<4x730xbf16>
    %cst_37 = arith.constant dense<0.000000e+00> : vector<2x730xf32>
    %41 = tpu.matmul %39, %40, %cst_37 {dimension_numbers = #tpu.dot_dimension_numbers<[1], [0], [0], [1], [0, 0, 1, 1], [], []>} : vector<2x4xbf16>, vector<4x730xbf16>, vector<2x730xf32> -> vector<2x730xf32>
    %42 = arith.addf %37, %41 : vector<2x730xf32>
    %c8 = arith.constant 8 : index
    %c0_38 = arith.constant 0 : index
    %c0_39 = arith.constant 0 : index
    %43 = vector.load %arg2[%c8, %c0_38, %c0_39] : memref<9x2x4xbf16, #tpu.memory_space<vmem>>, vector<1x2x4xbf16>
    %44 = vector.shape_cast %43 : vector<1x2x4xbf16> to vector<2x4xbf16>
    %c0_40 = arith.constant 0 : index
    %c38 = arith.constant 38 : index
    %45 = vector.load %arg1[%c0_40, %c38] : memref<4x768xbf16, #tpu.memory_space<vmem>>, vector<4x730xbf16>
    %cst_41 = arith.constant dense<0.000000e+00> : vector<2x730xf32>
    %46 = tpu.matmul %44, %45, %cst_41 {dimension_numbers = #tpu.dot_dimension_numbers<[1], [0], [0], [1], [0, 0, 1, 1], [], []>} : vector<2x4xbf16>, vector<4x730xbf16>, vector<2x730xf32> -> vector<2x730xf32>
    %47 = arith.addf %42, %46 : vector<2x730xf32>
    %c0_42 = arith.constant 0 : index
    %c0_43 = arith.constant 0 : index
    %48 = vector.load %arg3[%c0_42, %c0_43] : memref<2x1xf32, #tpu.memory_space<vmem>>, vector<2x1xf32>
    %49 = vector.broadcast %48 : vector<2x1xf32> to vector<2x730xf32>
    %50 = arith.addf %47, %49 : vector<2x730xf32>
    %c0_44 = arith.constant 0 : index
    %c0_45 = arith.constant 0 : index
    %51 = vector.load %arg4[%c0_44, %c0_45] : memref<2x768xf32, #tpu.memory_space<vmem>>, vector<2x730xf32>
    tpu.vector_store %arg4[%c0_44, %c0_45], %50 {strides = array<i32>} : memref<2x768xf32, #tpu.memory_space<vmem>>, vector<2x730xf32>,
    return
  }
  func.func @transform_0(%arg0: i32) -> (i32, i32) {
    %c0_i32 = arith.constant 0 : i32
    %c0_i32_0 = arith.constant 0 : i32
    return %c0_i32, %arg0 : i32, i32
  }
  func.func @transform_1(%arg0: i32) -> (i32, i32, i32) {
    %c0_i32 = arith.constant 0 : i32
    %c0_i32_0 = arith.constant 0 : i32
    %c0_i32_1 = arith.constant 0 : i32
    %c0_i32_2 = arith.constant 0 : i32
    return %c0_i32, %c0_i32_0, %c0_i32_1 : i32, i32, i32
  }
  func.func @transform_2(%arg0: i32) -> (i32, i32) {
    %c0_i32 = arith.constant 0 : i32
    %c0_i32_0 = arith.constant 0 : i32
    %c0_i32_1 = arith.constant 0 : i32
    return %c0_i32, %c0_i32_0 : i32, i32
  }
  func.func @transform_3(%arg0: i32) -> (i32, i32) {
    %c0_i32 = arith.constant 0 : i32
    %c0_i32_0 = arith.constant 0 : i32
    return %c0_i32, %arg0 : i32, i32
  }
}

</mosaic_0001>

<bundles_post_ra>
// kernel: dfi_block_forward.1
= control target key start
LH: loop header
LB: loop body
LE: loop exit
PB: predicated region body
PF: predicated region fallthrough
CT: control target
= control target key end

     0   :  { %s1379_s16 = smov 127   ;;  %s1380_s21 = smov 126   ;;  %vm51_vm0 = vcmask 1039360   ;;  %vm61_vm1 = vcmask 1041408   ;;  %vm57_vm2 = vcmask 31744   ;;  %vm293_vm3 = vcmask 1031168   ;;  %s1668_s0 = inlined_call_operand.vmem [shape: bf16[4,768], index: 0, kind: input, shape index: {}]   ;;  %s1669_s1 = inlined_call_operand.vmem [shape: bf16[9,2,4], index: 1, kind: input, shape index: {}]   ;;  %s1670_s2 = inlined_call_operand.vmem [shape: f32[2,1], index: 2, kind: input, shape index: {}]   ;;  %s1671_s3 = inlined_call_operand.vmem [shape: f32[2,768], index: 3, kind: output, shape index: {}]  }
   0x1   :  { %v1412_v0 = vld [vmem:[%s1668_s0] sm:$0xff]  ;;  %v19_v1 = vld [vmem:[%s1668_s0 + $0x8] sm:$0xf]  ;;  %s1381_s24 = smov 110   ;;  %s1382_s25 = smov 109   ;;  %vm437_vm4 = vcmask 900096  }
   0x2   :  { %23 = vst [vmem:[#allocation1] ss:$4 sm:$0xff] %v1412_v0  ;;  %v263_v8 = vld [vmem:[%s1668_s0 + $0x8] sm:$0xf]  ;;  %s1383_s26 = smov 108   ;;  %s1384_s29 = smov 92  }
   0x3   :  { %26 = vst [vmem:[#allocation1 + $0x20] ss:$4 sm:$0xff] %v19_v1  ;;  %v407_v16 = vld [vmem:[%s1668_s0 + $0x8] sm:$0xf]  ;;  %s1385_s5 = smov 91   ;;  %s1386_s12 = smov 90  }
   0x4   :  { %v551_v28 = vld [vmem:[%s1668_s0 + $0x8] sm:$0xf]  ;;  %vm581_vm5 = vcmask 891904   ;;  %vm725_vm6 = vcmask 883712   ;;  %vm869_vm7 = vcmask 752640   ;;  %vm1013_vm8 = vcmask 744448  }
   0x5   :  { %v695_v39 = vld [vmem:[%s1668_s0 + $0x8] sm:$0xf]  ;;  %vm1157_vm9 = vcmask 736256   ;;  %vm1291_vm10 = vcmask 1045508   ;;  %vm1293_vm11 = vcmask 1043456   ;;  %vm1299_vm12 = vcmask 732162  }
   0x6   :  { %v839_v47 = vld [vmem:[%s1668_s0 + $0x8] sm:$0xf]  ;;  %vm1300_vm13 = vmor %vm1299_vm12, %vm61_vm1 }
   0x9   :  { %v31_v2 = vld.sshfl [vmem:[#allocation1 + $0x10] sm:$0xff pattern:$0x73625140]  ;;  %v27_v3 = vld.sshfl [vmem:[#allocation1] sm:$0xff pattern:$0x73625140] }
   0xa   :  { %43 = vrot.lane.b32.xlu1 %v31_v2, %s1379_s16  ;;  %39 = vrot.lane.b32.xlu0 %v27_v3, %s1379_s16  ;;  %v33_v4 = vld.sshfl [vmem:[#allocation1 + $0x18] sm:$0xff pattern:$0x73625140]  ;;  %v29_v5 = vld.sshfl [vmem:[#allocation1 + $0x8] sm:$0xff pattern:$0x73625140] }
   0xb   :  { %158 = vst [vmem:[#allocation1] ss:$4 sm:$0xff] %v1412_v0  ;;  %v35_v6 = vld.sshfl [vmem:[#allocation1 + $0x20] sm:$0xff pattern:$0x73625140] }
   0xc   :  { %47 = vrot.lane.b32.xlu2 %v35_v6, %s1379_s16  ;;  %v37_v7 = vld.sshfl [vmem:[#allocation1 + $0x28] sm:$0xff pattern:$0x73625140]  ;;  %v1306_v3 = vld [vmem:[%s1669_s1 + $0x1] sm:$0x1] }
   0xd   :  { %160 = vst [vmem:[#allocation1 + $0x20] ss:$4 sm:$0xff] %v19_v1 }
  0x12   :  { %45 = vrot.lane.b32.xlu1 %v33_v4, %s1379_s16  ;;  %41 = vrot.lane.b32.xlu0 %v29_v5, %s1379_s16  ;;  %v1422_v9 = vld.sshfl [vmem:[#allocation1] sm:$0xff pattern:$0x73625140]  ;;  %v1424_v10 = vld.sshfl [vmem:[#allocation1 + $0x8] sm:$0xff pattern:$0x73625140] }
  0x13   :  { %v1426_v11 = vld.sshfl [vmem:[#allocation1 + $0x10] sm:$0xff pattern:$0x73625140]  ;;  %v1428_v12 = vld.sshfl [vmem:[#allocation1 + $0x18] sm:$0xff pattern:$0x73625140] }
  0x14   :  { %49 = vrot.lane.b32.xlu2 %v37_v7, %s1379_s16  ;;  %v1430_v13 = vld.sshfl [vmem:[#allocation1 + $0x20] sm:$0xff pattern:$0x73625140]  ;;  %v1432_v14 = vld.sshfl [vmem:[#allocation1 + $0x28] sm:$0xff pattern:$0x73625140] }
  0x15   :  { %268 = vst [vmem:[#allocation1 + $0x20] ss:$4 sm:$0xff] %v263_v8  ;;  %v170_v4 = vsel %vm61_vm1, %v1422_v9, 0  ;;  %v172_v5 = vsel %vm61_vm1, %v1424_v10, 0  ;;  %v174_v7 = vsel %vm61_vm1, %v1426_v11, 0  ;;  %v176_v8 = vsel %vm61_vm1, %v1428_v12, 0 }
  0x16   :  { %265 = vst [vmem:[#allocation1] ss:$4 sm:$0xff] %v1412_v0  ;;  %v180_v9 = vsel %vm61_vm1, %v1432_v14, 0  ;;  %v983_v12 = vld [vmem:[%s1668_s0 + $0x8] sm:$0xf] }
  0x1c   :  { %v279_v15 = vld.sshfl [vmem:[#allocation1 + $0x28] sm:$0xff pattern:$0x73625140]  ;;  %v277_v20 = vld.sshfl [vmem:[#allocation1 + $0x20] sm:$0xff pattern:$0x73625140] }
  0x1d   :  { %v269_v17 = vld.sshfl [vmem:[#allocation1] sm:$0xff pattern:$0x73625140]  ;;  %v273_v18 = vld.sshfl [vmem:[#allocation1 + $0x10] sm:$0xff pattern:$0x73625140] }
  0x1e   :  { %281 = vrot.lane.b32.xlu0 %v269_v17, %s1380_s21  ;;  %v271_v19 = vld.sshfl [vmem:[#allocation1 + $0x8] sm:$0xff pattern:$0x73625140]  ;;  %285 = vrot.lane.b32.xlu2 %v273_v18, %s1380_s21  ;;  %v275_v21 = vld.sshfl [vmem:[#allocation1 + $0x18] sm:$0xff pattern:$0x73625140] }
  0x1f   :  { %283 = vrot.lane.b32.xlu1 %v271_v19, %s1380_s21  ;;  %412 = vst [vmem:[#allocation1 + $0x20] ss:$4 sm:$0xff] %v407_v16  ;;  %v178_v16 = vsel %vm61_vm1, %v1430_v13, 0 }
  0x20   :  { %409 = vst [vmem:[#allocation1] ss:$4 sm:$0xff] %v1412_v0 }
  0x26   :  { %287 = vrot.lane.b32.xlu0 %v275_v21, %s1380_s21  ;;  %291 = vrot.lane.b32.xlu2 %v279_v15, %s1380_s21  ;;  %v423_v22 = vld.sshfl [vmem:[#allocation1 + $0x28] sm:$0xff pattern:$0x73625140]  ;;  %v421_v25 = vld.sshfl [vmem:[#allocation1 + $0x20] sm:$0xff pattern:$0x73625140] }
  0x27   :  { %289 = vrot.lane.b32.xlu1 %v277_v20, %s1380_s21  ;;  %v413_v23 = vld.sshfl [vmem:[#allocation1] sm:$0xff pattern:$0x73625140]  ;;  %v417_v24 = vld.sshfl [vmem:[#allocation1 + $0x10] sm:$0xff pattern:$0x73625140] }
  0x28   :  { %v415_v26 = vld.sshfl [vmem:[#allocation1 + $0x8] sm:$0xff pattern:$0x73625140]  ;;  %v419_v27 = vld.sshfl [vmem:[#allocation1 + $0x18] sm:$0xff pattern:$0x73625140] }
  0x29   :  { %553 = vst [vmem:[#allocation1] ss:$4 sm:$0xff] %v1412_v0  ;;  %v17_v20 = vld [vmem:[%s1669_s1] sm:$0x1] }
  0x2a   :  { %556 = vst [vmem:[#allocation1 + $0x20] ss:$4 sm:$0xff] %v551_v28 }
  0x2e   :  { %425 = vrot.lane.b32.xlu0 %v413_v23, %s1381_s24  ;;  %429 = vrot.lane.b32.xlu2 %v417_v24, %s1381_s24 }
  0x2f   :  { %427 = vrot.lane.b32.xlu1 %v415_v26, %s1381_s24 }
  0x30   :  { %v557_v29 = vld.sshfl [vmem:[#allocation1] sm:$0xff pattern:$0x73625140]  ;;  %v561_v30 = vld.sshfl [vmem:[#allocation1 + $0x10] sm:$0xff pattern:$0x73625140] }
  0x31   :  { %v559_v31 = vld.sshfl [vmem:[#allocation1 + $0x8] sm:$0xff pattern:$0x73625140]  ;;  %v563_v32 = vld.sshfl [vmem:[#allocation1 + $0x18] sm:$0xff pattern:$0x73625140] }
  0x32   :  { %697 = vst [vmem:[#allocation1] ss:$4 sm:$0xff] %v1412_v0  ;;  %v565_v33 = vld.sshfl [vmem:[#allocation1 + $0x20] sm:$0xff pattern:$0x73625140] }
  0x33   :  { %v567_v34 = vld.sshfl [vmem:[#allocation1 + $0x28] sm:$0xff pattern:$0x73625140] }
  0x34   :  { %700 = vst [vmem:[#allocation1 + $0x20] ss:$4 sm:$0xff] %v695_v39 }
  0x36   :  { %431 = vrot.lane.b32.xlu0 %v419_v27, %s1381_s24  ;;  %435 = vrot.lane.b32.xlu2 %v423_v22, %s1381_s24 }
  0x37   :  { %433 = vrot.lane.b32.xlu1 %v421_v25, %s1381_s24 }
  0x39   :  { %v701_v35 = vld.sshfl [vmem:[#allocation1] sm:$0xff pattern:$0x73625140]  ;;  %v705_v36 = vld.sshfl [vmem:[#allocation1 + $0x10] sm:$0xff pattern:$0x73625140] }
  0x3a   :  { %v703_v37 = vld.sshfl [vmem:[#allocation1 + $0x8] sm:$0xff pattern:$0x73625140]  ;;  %v707_v38 = vld.sshfl [vmem:[#allocation1 + $0x18] sm:$0xff pattern:$0x73625140] }
  0x3b   :  { %841 = vst [vmem:[#allocation1] ss:$4 sm:$0xff] %v1412_v0  ;;  %v709_v42 = vld.sshfl [vmem:[#allocation1 + $0x20] sm:$0xff pattern:$0x73625140] }
  0x3c   :  { %v711_v46 = vld.sshfl [vmem:[#allocation1 + $0x28] sm:$0xff pattern:$0x73625140] }
  0x3d   :  { %844 = vst [vmem:[#allocation1 + $0x20] ss:$4 sm:$0xff] %v839_v47 }
  0x3e   :  { %569 = vrot.lane.b32.xlu0 %v557_v29, %s1382_s25  ;;  %573 = vrot.lane.b32.xlu2 %v561_v30, %s1382_s25 }
  0x3f   :  { %571 = vrot.lane.b32.xlu1 %v559_v31, %s1382_s25 }
  0x42   :  { %v849_v40 = vld.sshfl [vmem:[#allocation1 + $0x10] sm:$0xff pattern:$0x73625140]  ;;  %v845_v41 = vld.sshfl [vmem:[#allocation1] sm:$0xff pattern:$0x73625140] }
  0x43   :  { %v847_v43 = vld.sshfl [vmem:[#allocation1 + $0x8] sm:$0xff pattern:$0x73625140]  ;;  %v851_v44 = vld.sshfl [vmem:[#allocation1 + $0x18] sm:$0xff pattern:$0x73625140] }
  0x44   :  { %985 = vst [vmem:[#allocation1] ss:$4 sm:$0xff] %v1412_v0  ;;  %v853_v53 = vld.sshfl [vmem:[#allocation1 + $0x20] sm:$0xff pattern:$0x73625140] }
  0x45   :  { %v855_v15 = vld.sshfl [vmem:[#allocation1 + $0x28] sm:$0xff pattern:$0x73625140] }
  0x46   :  { %575 = vrot.lane.b32.xlu0 %v563_v32, %s1382_s25  ;;  %579 = vrot.lane.b32.xlu2 %v567_v34, %s1382_s25  ;;  %988 = vst [vmem:[#allocation1 + $0x20] ss:$4 sm:$0xff] %v983_v12 }
  0x47   :  { %577 = vrot.lane.b32.xlu1 %v565_v33, %s1382_s25 }
  0x4b   :  { %v989_v50 = vld.sshfl [vmem:[#allocation1] sm:$0xff pattern:$0x73625140]  ;;  %v993_v6 = vld.sshfl [vmem:[#allocation1 + $0x10] sm:$0xff pattern:$0x73625140] }
  0x4c   :  { %v991_v10 = vld.sshfl [vmem:[#allocation1 + $0x8] sm:$0xff pattern:$0x73625140]  ;;  %v995_v11 = vld.sshfl [vmem:[#allocation1 + $0x18] sm:$0xff pattern:$0x73625140] }
  0x4d   :  { %1129 = vst [vmem:[#allocation1] ss:$4 sm:$0xff] %v1412_v0  ;;  %v997_v0 = vld.sshfl [vmem:[#allocation1 + $0x20] sm:$0xff pattern:$0x73625140] }
  0x4e   :  { %713 = vrot.lane.b32.xlu0 %v701_v35, %s1383_s26  ;;  %717 = vrot.lane.b32.xlu2 %v705_v36, %s1383_s26 }
  0x4f   :  { %715 = vrot.lane.b32.xlu1 %v703_v37, %s1383_s26 }
  0x54   :  { %v1133_v30 = vld.sshfl [vmem:[#allocation1] sm:$0xff pattern:$0x73625140]  ;;  %v1135_v31 = vld.sshfl [vmem:[#allocation1 + $0x8] sm:$0xff pattern:$0x73625140] }
  0x55   :  { %v1139_v33 = vld.sshfl [vmem:[#allocation1 + $0x18] sm:$0xff pattern:$0x73625140] }
  0x56   :  { %719 = vrot.lane.b32.xlu0 %v707_v38, %s1383_s26  ;;  %723 = vrot.lane.b32.xlu2 %v711_v46, %s1383_s26 }
  0x57   :  { %721 = vrot.lane.b32.xlu1 %v709_v42, %s1383_s26 }
  0x5e   :  { %857 = vrot.lane.b32.xlu0 %v845_v41, %s1384_s29  ;;  %861 = vrot.lane.b32.xlu2 %v849_v40, %s1384_s29 }
  0x5f   :  { %859 = vrot.lane.b32.xlu1 %v847_v43, %s1384_s29  ;;  %v999_v43 = vld.sshfl [vmem:[#allocation1 + $0x28] sm:$0xff pattern:$0x73625140] }
  0x66   :  { %v48_v45 = vpop.permute.xlu2 %47  ;;  %863 = vrot.lane.b32.xlu0 %v851_v44, %s1384_s29  ;;  %867 = vrot.lane.b32.xlu2 %v855_v15, %s1384_s29  ;;  %v1127_v44 = vld [vmem:[%s1668_s0 + $0x8] sm:$0xf] }
  0x67   :  { %865 = vrot.lane.b32.xlu1 %v853_v53, %s1384_s29  ;;  %1132 = vst [vmem:[#allocation1 + $0x20] ss:$4 sm:$0xff] %v1127_v44 }
  0x6e   :  { %1001 = vrot.lane.b32.xlu0 %v989_v50, %s1385_s5  ;;  %v50_v51 = vpop.permute.xlu2 %49  ;;  %1005 = vrot.lane.b32.xlu2 %v993_v6, %s1385_s5  ;;  %v1141_v47 = vld.sshfl [vmem:[#allocation1 + $0x20] sm:$0xff pattern:$0x73625140] }
  0x6f   :  { %v56_v52 = vsel %vm51_vm0, %v48_v45, %v50_v51  ;;  %v78_v57 = vsel %vm61_vm1, %v50_v51, 0  ;;  %1003 = vrot.lane.b32.xlu1 %v991_v10, %s1385_s5  ;;  %v1319_v51 = vld [vmem:[%s1669_s1 + $0x2] sm:$0x1] }
  0x70   :  { %v75_v56 = vsel %vm61_vm1, %v56_v52, 0 }
  0x76   :  { %1007 = vrot.lane.b32.xlu0 %v995_v11, %s1385_s5  ;;  %1011 = vrot.lane.b32.xlu2 %v999_v43, %s1385_s5 }
  0x77   :  { %1009 = vrot.lane.b32.xlu1 %v997_v0, %s1385_s5 }
  0x78   :  { %v286_v13 = vpop.permute.xlu2 %285 }
  0x7c   :  { %v44_v48 = vpop.permute.xlu1 %43  ;;  %v40_v49 = vpop.permute.xlu0 %39 }
  0x7e   :  { %1145 = vrot.lane.b32.xlu0 %v1133_v30, %s1386_s12 }
  0x7f   :  { %1147 = vrot.lane.b32.xlu1 %v1135_v31, %s1386_s12 }
  0x80   :  { %v292_v25 = vpop.permute.xlu2 %291 }
  0x81   :  { %v318_v39 = vsel %vm61_vm1, %v292_v25, 0 }
  0x84   :  { %v46_v54 = vpop.permute.xlu1 %45  ;;  %v42_v55 = vpop.permute.xlu0 %41 }
  0x85   :  { %v52_v58 = vsel %vm51_vm0, %v40_v49, %v42_v55  ;;  %v53_v59 = vsel %vm51_vm0, %v42_v55, %v44_v48  ;;  %v54_v60 = vsel %vm51_vm0, %v44_v48, %v46_v54  ;;  %v55_v61 = vsel %vm51_vm0, %v46_v54, %v48_v45 }
  0x86   :  { %v63_v62 = vsel %vm61_vm1, %v52_v58, 0  ;;  %v66_v63 = vsel %vm61_vm1, %v53_v59, 0  ;;  %v69_v1 = vsel %vm61_vm1, %v54_v60, 0  ;;  %v72_v2 = vsel %vm61_vm1, %v55_v61, 0  ;;  %1151 = vrot.lane.b32.xlu0 %v1139_v33, %s1386_s12 }
  0x87   :  { %87 = vmatpush.bf16.msra.mxu0 %v63_v62  ;;  %100 = vmatpush.bf16.msra.mxu1 %v66_v63  ;;  %v1137_v59 = vld.sshfl [vmem:[#allocation1 + $0x10] sm:$0xff pattern:$0x73625140]  ;;  %v1143_v61 = vld.sshfl [vmem:[#allocation1 + $0x28] sm:$0xff pattern:$0x73625140] }
  0x88   :  { %113 = vmatpush.bf16.msra.mxu2 %v69_v1  ;;  %126 = vmatpush.bf16.msra.mxu3 %v72_v2  ;;  %v430_v32 = vpop.permute.xlu2 %429 }
  0x89   :  { %1153 = vrot.lane.b32.xlu1 %v1141_v47, %s1386_s12  ;;  %1149 = vrot.lane.b32.xlu2 %v1137_v59, %s1386_s12 }
  0x8a   :  { %1307 = vmatmul.msk.bf16.vlgmr.msra.gmra.mxu0 %vm57_vm2, %v1306_v3  ;;  %1308 = vmatmul.msk.bf16.vlgmr.msra.gmra.mxu1 %vm57_vm2, %v1306_v3 }
  0x8b   :  { %139 = vmatpush.bf16.msrb.mxu0 %v75_v56  ;;  %152 = vmatpush.bf16.msrb.mxu1 %v78_v57 }
  0x8c   :  { %1309 = vmatmul.msk.bf16.vlgmr.msra.gmra.mxu2 %vm57_vm2, %v1306_v3  ;;  %1310 = vmatmul.msk.bf16.vlgmr.msra.gmra.mxu3 %vm57_vm2, %v1306_v3 }
  0x8d   :  { %189 = vmatpush.bf16.msrb.mxu2 %v170_v4  ;;  %202 = vmatpush.bf16.msrb.mxu3 %v172_v5  ;;  %v1326_v5 = vld [vmem:[%s1669_s1 + $0x3] sm:$0x1] }
  0x8f   :  { %215 = vmatpush.bf16.msra.mxu0 %v174_v7  ;;  %228 = vmatpush.bf16.msra.mxu1 %v176_v8 }
  0x90   :  { %v282_v14 = vpop.permute.xlu0 %281  ;;  %v436_v48 = vpop.permute.xlu2 %435 }
  0x91   :  { %241 = vmatpush.bf16.msra.mxu2 %v178_v16  ;;  %254 = vmatpush.bf16.msra.mxu3 %v180_v9  ;;  %v284_v17 = vpop.permute.xlu1 %283  ;;  %v462_v55 = vsel %vm61_vm1, %v436_v48, 0 }
  0x92   :  { %v294_v18 = vsel %vm293_vm3, %v282_v14, %v284_v17  ;;  %v295_v19 = vsel %vm293_vm3, %v284_v17, %v286_v13  ;;  %1155 = vrot.lane.b32.xlu2 %v1143_v61, %s1386_s12 }
  0x93   :  { %v303_v22 = vsel %vm61_vm1, %v294_v18, 0  ;;  %v306_v23 = vsel %vm61_vm1, %v295_v19, 0 }
  0x98   :  { %v288_v21 = vpop.permute.xlu0 %287  ;;  %v574_v60 = vpop.permute.xlu2 %573 }
  0x99   :  { %v296_v24 = vsel %vm293_vm3, %v286_v13, %v288_v21  ;;  %v290_v26 = vpop.permute.xlu1 %289 }
  0x9a   :  { %1311 = vmatmul.msk.bf16.vlgmr.msrb.gmra.mxu0 %vm57_vm2, %v1306_v3  ;;  %1312 = vmatmul.msk.bf16.vlgmr.msrb.gmra.mxu1 %vm57_vm2, %v1306_v3  ;;  %v309_v27 = vsel %vm61_vm1, %v296_v24, 0  ;;  %v297_v28 = vsel %vm293_vm3, %v288_v21, %v290_v26  ;;  %v298_v36 = vsel %vm293_vm3, %v290_v26, %v292_v25  ;;  %v1333_v25 = vld [vmem:[%s1669_s1 + $0x4] sm:$0x1] }
  0x9b   :  { %v312_v29 = vsel %vm61_vm1, %v297_v28, 0  ;;  %327 = vmatpush.bf16.msrb.mxu0 %v303_v22  ;;  %340 = vmatpush.bf16.msrb.mxu1 %v306_v23  ;;  %v315_v40 = vsel %vm61_vm1, %v298_v36, 0 }
  0x9c   :  { %1313 = vmatmul.msk.bf16.vlgmr.msrb.gmra.mxu2 %vm57_vm2, %v17_v20  ;;  %1314 = vmatmul.msk.bf16.vlgmr.msrb.gmra.mxu3 %vm57_vm2, %v17_v20 }
  0x9d   :  { %353 = vmatpush.bf16.msrb.mxu2 %v309_v27  ;;  %366 = vmatpush.bf16.msrb.mxu3 %v312_v29 }
  0xa0   :  { %v426_v34 = vpop.permute.xlu0 %425  ;;  %v580_v15 = vpop.permute.xlu2 %579 }
  0xa1   :  { %v428_v35 = vpop.permute.xlu1 %427  ;;  %v606_v17 = vsel %vm61_vm1, %v580_v15, 0 }
  0xa2   :  { %v438_v37 = vsel %vm437_vm4, %v426_v34, %v428_v35  ;;  %v439_v38 = vsel %vm437_vm4, %v428_v35, %v430_v32 }
  0xa3   :  { %v447_v41 = vsel %vm61_vm1, %v438_v37, 0  ;;  %v450_v42 = vsel %vm61_vm1, %v439_v38, 0 }
  0xa8   :  { %v432_v46 = vpop.permute.xlu0 %431  ;;  %v718_v10 = vpop.permute.xlu2 %717 }
  0xa9   :  { %v434_v45 = vpop.permute.xlu1 %433  ;;  %v440_v49 = vsel %vm437_vm4, %v430_v32, %v432_v46 }
  0xaa   :  { %1315 = vmatmul.msk.bf16.vlgmr.msra.gmra.mxu0 %vm57_vm2, %v17_v20  ;;  %1316 = vmatmul.msk.bf16.vlgmr.msra.gmra.mxu1 %vm57_vm2, %v17_v20  ;;  %v441_v50 = vsel %vm437_vm4, %v432_v46, %v434_v45  ;;  %v442_v52 = vsel %vm437_vm4, %v434_v45, %v436_v48  ;;  %v453_v53 = vsel %vm61_vm1, %v440_v49, 0 }
  0xab   :  { %379 = vmatpush.bf16.msra.mxu0 %v315_v40  ;;  %392 = vmatpush.bf16.msra.mxu1 %v318_v39  ;;  %v456_v54 = vsel %vm61_vm1, %v441_v50, 0  ;;  %v459_v56 = vsel %vm61_vm1, %v442_v52, 0  ;;  %v1340_v40 = vld [vmem:[%s1669_s1 + $0x5] sm:$0x1] }
  0xac   :  { %1317 = vmatmul.msk.bf16.vlgmr.msra.gmra.mxu2 %vm57_vm2, %v17_v20  ;;  %1318 = vmatmul.msk.bf16.vlgmr.msra.gmra.mxu3 %vm57_vm2, %v17_v20 }
  0xad   :  { %471 = vmatpush.bf16.msra.mxu2 %v447_v41  ;;  %484 = vmatpush.bf16.msra.mxu3 %v450_v42 }
  0xb0   :  { %v570_v57 = vpop.permute.xlu0 %569  ;;  %v724_v22 = vpop.permute.xlu2 %723 }
  0xb1   :  { %v572_v58 = vpop.permute.xlu1 %571  ;;  %v750_v29 = vsel %vm61_vm1, %v724_v22, 0 }
  0xb2   :  { %v582_v1 = vsel %vm581_vm5, %v570_v57, %v572_v58  ;;  %v583_v2 = vsel %vm581_vm5, %v572_v58, %v574_v60 }
  0xb3   :  { %v591_v6 = vsel %vm61_vm1, %v582_v1, 0  ;;  %v594_v7 = vsel %vm61_vm1, %v583_v2, 0 }
  0xb8   :  { %v576_v62 = vpop.permute.xlu0 %575  ;;  %v862_v33 = vpop.permute.xlu2 %861 }
  0xb9   :  { %v578_v63 = vpop.permute.xlu1 %577  ;;  %v584_v3 = vsel %vm581_vm5, %v574_v60, %v576_v62 }
  0xba   :  { %1320 = vmatmul.msk.bf16.vlgmr.msrb.gmra.mxu0 %vm57_vm2, %v1319_v51  ;;  %1321 = vmatmul.msk.bf16.vlgmr.msrb.gmra.mxu1 %vm57_vm2, %v1319_v51  ;;  %v585_v4 = vsel %vm581_vm5, %v576_v62, %v578_v63  ;;  %v597_v8 = vsel %vm61_vm1, %v584_v3, 0  ;;  %v586_v12 = vsel %vm581_vm5, %v578_v63, %v580_v15 }
  0xbb   :  { %497 = vmatpush.bf16.msrb.mxu0 %v453_v53  ;;  %510 = vmatpush.bf16.msrb.mxu1 %v456_v54  ;;  %v600_v16 = vsel %vm61_vm1, %v585_v4, 0  ;;  %v603_v0 = vsel %vm61_vm1, %v586_v12, 0 }
  0xbc   :  { %1322 = vmatmul.msk.bf16.vlgmr.msrb.gmra.mxu2 %vm57_vm2, %v1319_v51  ;;  %1323 = vmatmul.msk.bf16.vlgmr.msrb.gmra.mxu3 %vm57_vm2, %v1319_v51 }
  0xbd   :  { %523 = vmatpush.bf16.msrb.mxu2 %v459_v56  ;;  %536 = vmatpush.bf16.msrb.mxu3 %v462_v55 }
  0xc0   :  { %v714_v9 = vpop.permute.xlu0 %713  ;;  %v868_v44 = vpop.permute.xlu2 %867 }
  0xc1   :  { %v716_v11 = vpop.permute.xlu1 %715  ;;  %v894_v54 = vsel %vm61_vm1, %v868_v44, 0 }
  0xc2   :  { %v726_v13 = vsel %vm725_vm6, %v714_v9, %v716_v11  ;;  %v727_v14 = vsel %vm725_vm6, %v716_v11, %v718_v10 }
  0xc3   :  { %v735_v18 = vsel %vm61_vm1, %v726_v13, 0  ;;  %v738_v19 = vsel %vm61_vm1, %v727_v14, 0 }
  0xc8   :  { %v720_v20 = vpop.permute.xlu0 %719  ;;  %v1006_v47 = vpop.permute.xlu2 %1005 }
  0xc9   :  { %v722_v21 = vpop.permute.xlu1 %721  ;;  %v728_v23 = vsel %vm725_vm6, %v718_v10, %v720_v20 }
  0xca   :  { %1324 = vmatmul.msk.bf16.vlgmr.msra.gmra.mxu0 %vm57_vm2, %v1319_v51  ;;  %1325 = vmatmul.msk.bf16.vlgmr.msra.gmra.mxu1 %vm57_vm2, %v1319_v51  ;;  %v729_v24 = vsel %vm725_vm6, %v720_v20, %v722_v21  ;;  %v730_v26 = vsel %vm725_vm6, %v722_v21, %v724_v22  ;;  %v741_v27 = vsel %vm61_vm1, %v728_v23, 0 }
  0xcb   :  { %615 = vmatpush.bf16.msra.mxu0 %v591_v6  ;;  %628 = vmatpush.bf16.msra.mxu1 %v594_v7  ;;  %v744_v28 = vsel %vm61_vm1, %v729_v24, 0  ;;  %v747_v30 = vsel %vm61_vm1, %v730_v26, 0 }
  0xcc   :  { %1327 = vmatmul.msk.bf16.vlgmr.msra.gmra.mxu2 %vm57_vm2, %v1326_v5  ;;  %1328 = vmatmul.msk.bf16.vlgmr.msra.gmra.mxu3 %vm57_vm2, %v1326_v5 }
  0xcd   :  { %641 = vmatpush.bf16.msra.mxu2 %v597_v8  ;;  %654 = vmatpush.bf16.msra.mxu3 %v600_v16  ;;  %v1347_v8 = vld [vmem:[%s1669_s1 + $0x6] sm:$0x1] }
  0xd0   :  { %v858_v31 = vpop.permute.xlu0 %857  ;;  %v1012_v1 = vpop.permute.xlu2 %1011 }
  0xd1   :  { %v860_v32 = vpop.permute.xlu1 %859  ;;  %v1038_v10 = vsel %vm61_vm1, %v1012_v1, 0 }
  0xd2   :  { %v870_v35 = vsel %vm869_vm7, %v858_v31, %v860_v32  ;;  %v871_v36 = vsel %vm869_vm7, %v860_v32, %v862_v33  ;;  %v1354_v32 = vld [vmem:[%s1669_s1 + $0x7] sm:$0x1] }
  0xd3   :  { %v879_v41 = vsel %vm61_vm1, %v870_v35, 0  ;;  %v882_v42 = vsel %vm61_vm1, %v871_v36, 0 }
  0xd8   :  { %v864_v34 = vpop.permute.xlu0 %863 }
  0xd9   :  { %v866_v37 = vpop.permute.xlu1 %865  ;;  %v872_v38 = vsel %vm869_vm7, %v862_v33, %v864_v34 }
  0xda   :  { %1329 = vmatmul.msk.bf16.vlgmr.msrb.gmra.mxu0 %vm57_vm2, %v1326_v5  ;;  %1330 = vmatmul.msk.bf16.vlgmr.msrb.gmra.mxu1 %vm57_vm2, %v1326_v5  ;;  %v873_v39 = vsel %vm869_vm7, %v864_v34, %v866_v37  ;;  %v885_v43 = vsel %vm61_vm1, %v872_v38, 0  ;;  %v874_v49 = vsel %vm869_vm7, %v866_v37, %v868_v44 }
  0xdb   :  { %667 = vmatpush.bf16.msrb.mxu0 %v603_v0  ;;  %680 = vmatpush.bf16.msrb.mxu1 %v606_v17  ;;  %v888_v45 = vsel %vm61_vm1, %v873_v39, 0  ;;  %v891_v55 = vsel %vm61_vm1, %v874_v49, 0 }
  0xdc   :  { %1331 = vmatmul.msk.bf16.vlgmr.msrb.gmra.mxu2 %vm57_vm2, %v1326_v5  ;;  %1332 = vmatmul.msk.bf16.vlgmr.msrb.gmra.mxu3 %vm57_vm2, %v1326_v5 }
  0xdd   :  { %759 = vmatpush.bf16.msrb.mxu2 %v735_v18  ;;  %772 = vmatpush.bf16.msrb.mxu3 %v738_v19 }
  0xe0   :  { %v1002_v46 = vpop.permute.xlu0 %1001 }
  0xe1   :  { %v1004_v48 = vpop.permute.xlu1 %1003 }
  0xe2   :  { %v1014_v52 = vsel %vm1013_vm8, %v1002_v46, %v1004_v48  ;;  %v1015_v53 = vsel %vm1013_vm8, %v1004_v48, %v1006_v47 }
  0xe3   :  { %v1023_v56 = vsel %vm61_vm1, %v1014_v52, 0  ;;  %v1026_v57 = vsel %vm61_vm1, %v1015_v53, 0  ;;  %v1150_v21 = vpop.permute.xlu2 %1149  ;;  %v1268_v52 = vld [vmem:[%s1670_s2] sm:$0x3] }
  0xe8   :  { %v1008_v62 = vpop.permute.xlu0 %1007 }
  0xe9   :  { %v1010_v63 = vpop.permute.xlu1 %1009  ;;  %v1016_v4 = vsel %vm1013_vm8, %v1006_v47, %v1008_v62 }
  0xea   :  { %1334 = vmatmul.msk.bf16.vlgmr.msra.gmra.mxu0 %vm57_vm2, %v1333_v25  ;;  %1335 = vmatmul.msk.bf16.vlgmr.msra.gmra.mxu1 %vm57_vm2, %v1333_v25  ;;  %v1017_v5 = vsel %vm1013_vm8, %v1008_v62, %v1010_v63  ;;  %v1018_v15 = vsel %vm1013_vm8, %v1010_v63, %v1012_v1  ;;  %v1029_v16 = vsel %vm61_vm1, %v1016_v4, 0  ;;  %v1361_v4 = vld [vmem:[%s1669_s1 + $0x8] sm:$0x1] }
  0xeb   :  { %785 = vmatpush.bf16.msra.mxu0 %v741_v27  ;;  %798 = vmatpush.bf16.msra.mxu1 %v744_v28  ;;  %v1032_v9 = vsel %vm61_vm1, %v1017_v5, 0  ;;  %v1035_v11 = vsel %vm61_vm1, %v1018_v15, 0 }
  0xec   :  { %1336 = vmatmul.msk.bf16.vlgmr.msra.gmra.mxu2 %vm57_vm2, %v1333_v25  ;;  %1337 = vmatmul.msk.bf16.vlgmr.msra.gmra.mxu3 %vm57_vm2, %v1333_v25 }
  0xed   :  { %811 = vmatpush.bf16.msra.mxu2 %v747_v30  ;;  %824 = vmatpush.bf16.msra.mxu3 %v750_v29 }
  0xf0   :  { %v1146_v12 = vpop.permute.xlu0 %1145 }
  0xf1   :  { %v1148_v13 = vpop.permute.xlu1 %1147 }
  0xf2   :  { %v1159_v26 = vsel %vm1157_vm9, %v1148_v13, %v1150_v21 }
  0xf3   :  { %v1170_v35 = vsel %vm61_vm1, %v1159_v26, 0 }
  0xf8   :  { %v1152_v22 = vpop.permute.xlu0 %1151 }
  0xf9   :  { %v1160_v29 = vsel %vm1157_vm9, %v1150_v21, %v1152_v22 }
  0xfa   :  { %1338 = vmatmul.msk.bf16.vlgmr.msrb.gmra.mxu0 %vm57_vm2, %v1333_v25  ;;  %1339 = vmatmul.msk.bf16.vlgmr.msrb.gmra.mxu1 %vm57_vm2, %v1333_v25  ;;  %v1158_v25 = vsel %vm1157_vm9, %v1146_v12, %v1148_v13  ;;  %v1173_v37 = vsel %vm61_vm1, %v1160_v29, 0 }
  0xfb   :  { %903 = vmatpush.bf16.msrb.mxu0 %v879_v41  ;;  %916 = vmatpush.bf16.msrb.mxu1 %v882_v42  ;;  %v1154_v33 = vpop.permute.xlu1 %1153  ;;  %v1167_v34 = vsel %vm61_vm1, %v1158_v25, 0 }
  0xfc   :  { %1341 = vmatmul.msk.bf16.vlgmr.msrb.gmra.mxu2 %vm57_vm2, %v1340_v40  ;;  %1342 = vmatmul.msk.bf16.vlgmr.msrb.gmra.mxu3 %vm57_vm2, %v1340_v40  ;;  %v1161_v36 = vsel %vm1157_vm9, %v1152_v22, %v1154_v33 }
  0xfd   :  { %929 = vmatpush.bf16.msrb.mxu2 %v885_v43  ;;  %942 = vmatpush.bf16.msrb.mxu3 %v888_v45  ;;  %v1176_v38 = vsel %vm61_vm1, %v1161_v36, 0  ;;  %v1156_v45 = vpop.permute.xlu2 %1155 }
  0xfe   :  { %v1162_v48 = vsel %vm1157_vm9, %v1154_v33, %v1156_v45 }
 0x107   :  { %v89_v50 = vpop.f32.mrf.mxu0  ;;  %v102_v51 = vpop.f32.mrf.mxu1 }
 0x10a   :  { %1343 = vmatmul.msk.bf16.vlgmr.msra.gmra.mxu0 %vm57_vm2, %v1340_v40  ;;  %1344 = vmatmul.msk.bf16.vlgmr.msra.gmra.mxu1 %vm57_vm2, %v1340_v40 }
 0x10b   :  { %955 = vmatpush.bf16.msra.mxu0 %v891_v55  ;;  %968 = vmatpush.bf16.msra.mxu1 %v894_v54  ;;  %v1182_v55 = vsel %vm61_vm1, %v1156_v45, 0 }
 0x10c   :  { %1345 = vmatmul.msk.bf16.vlgmr.msra.gmra.mxu2 %vm57_vm2, %v1340_v40  ;;  %1346 = vmatmul.msk.bf16.vlgmr.msra.gmra.mxu3 %vm57_vm2, %v1340_v40 }
 0x10d   :  { %1047 = vmatpush.bf16.msra.mxu2 %v1023_v56  ;;  %1060 = vmatpush.bf16.msra.mxu3 %v1026_v57  ;;  %v1179_v56 = vsel %vm61_vm1, %v1162_v48, 0 }
 0x10f   :  { %v115_v58 = vpop.f32.mrf.mxu2  ;;  %v128_v59 = vpop.f32.mrf.mxu3 }
 0x110   :  { %v91_v60 = vpop.f32.mrf.mxu0  ;;  %v104_v61 = vpop.f32.mrf.mxu1 }
 0x117   :  { %v117_v2 = vpop.f32.mrf.mxu2  ;;  %v130_v3 = vpop.f32.mrf.mxu3 }
 0x118   :  { %v141_v6 = vpop.f32.mrf.mxu0  ;;  %v154_v7 = vpop.f32.mrf.mxu1 }
 0x11a   :  { %1348 = vmatmul.msk.bf16.vlgmr.msrb.gmra.mxu0 %vm57_vm2, %v1347_v8  ;;  %1349 = vmatmul.msk.bf16.vlgmr.msrb.gmra.mxu1 %vm57_vm2, %v1347_v8 }
 0x11b   :  { %1073 = vmatpush.bf16.msrb.mxu0 %v1029_v16  ;;  %1086 = vmatpush.bf16.msrb.mxu1 %v1032_v9 }
 0x11c   :  { %1350 = vmatmul.msk.bf16.vlgmr.msrb.gmra.mxu2 %vm57_vm2, %v1347_v8  ;;  %1351 = vmatmul.msk.bf16.vlgmr.msrb.gmra.mxu3 %vm57_vm2, %v1347_v8 }
 0x11d   :  { %1099 = vmatpush.bf16.msrb.mxu2 %v1035_v11  ;;  %1112 = vmatpush.bf16.msrb.mxu3 %v1038_v10 }
 0x11f   :  { %v191_v14 = vpop.f32.mrf.mxu2  ;;  %v204_v17 = vpop.f32.mrf.mxu3 }
 0x120   :  { %v192_v0 = vadd.f32 %v191_v14, %v89_v50  ;;  %v205_v18 = vadd.f32 %v204_v17, %v102_v51  ;;  %v143_v19 = vpop.f32.mrf.mxu0  ;;  %v156_v20 = vpop.f32.mrf.mxu1  ;;  %v1387_v51 = vmov 0  }
 0x121   :  { %1378 = vset.pattern.permute.xlu0 %v1387_v51 }
 0x122   :  { %1271 = vperm.xlu0 %1378, %v1268_v52  }
 0x127   :  { %v193_v23 = vpop.f32.mrf.mxu2  ;;  %v206_v24 = vpop.f32.mrf.mxu3 }
 0x128   :  { %v217_v27 = vpop.f32.mrf.mxu0  ;;  %v230_v28 = vpop.f32.mrf.mxu1 }
 0x129   :  { %v218_v30 = vadd.f32 %v217_v27, %v115_v58  ;;  %v231_v31 = vadd.f32 %v230_v28, %v128_v59 }
 0x12a   :  { %1352 = vmatmul.msk.bf16.vlgmr.msra.gmra.mxu0 %vm57_vm2, %v1347_v8  ;;  %1353 = vmatmul.msk.bf16.vlgmr.msra.gmra.mxu1 %vm57_vm2, %v1347_v8 }
 0x12b   :  { %1191 = vmatpush.bf16.msra.mxu0 %v1167_v34  ;;  %1204 = vmatpush.bf16.msra.mxu1 %v1170_v35 }
 0x12c   :  { %1355 = vmatmul.msk.bf16.vlgmr.msra.gmra.mxu2 %vm57_vm2, %v1354_v32  ;;  %1356 = vmatmul.msk.bf16.vlgmr.msra.gmra.mxu3 %vm57_vm2, %v1354_v32 }
 0x12d   :  { %1217 = vmatpush.bf16.msra.mxu2 %v1173_v37  ;;  %1230 = vmatpush.bf16.msra.mxu3 %v1176_v38 }
 0x12f   :  { %v243_v39 = vpop.f32.mrf.mxu2  ;;  %v256_v40 = vpop.f32.mrf.mxu3 }
 0x130   :  { %v244_v41 = vadd.f32 %v243_v39, %v141_v6  ;;  %v257_v42 = vadd.f32 %v256_v40, %v154_v7  ;;  %v219_v43 = vpop.f32.mrf.mxu0  ;;  %v232_v44 = vpop.f32.mrf.mxu1 }
 0x137   :  { %v245_v46 = vpop.f32.mrf.mxu2  ;;  %v258_v47 = vpop.f32.mrf.mxu3 }
 0x138   :  { %v329_v49 = vpop.f32.mrf.mxu0  ;;  %v342_v50 = vpop.f32.mrf.mxu1 }
 0x139   :  { %v398_v53 = vadd.f32 %v329_v49, %v192_v0  ;;  %v399_v54 = vadd.f32 %v342_v50, %v205_v18 }
 0x13a   :  { %1357 = vmatmul.msk.bf16.vlgmr.msrb.gmra.mxu0 %vm57_vm2, %v1354_v32  ;;  %1358 = vmatmul.msk.bf16.vlgmr.msrb.gmra.mxu1 %vm57_vm2, %v1354_v32 }
 0x13b   :  { %1243 = vmatpush.bf16.msrb.mxu0 %v1179_v56  ;;  %1256 = vmatpush.bf16.msrb.mxu1 %v1182_v55 }
 0x13c   :  { %1359 = vmatmul.msk.bf16.vlgmr.msrb.gmra.mxu2 %vm57_vm2, %v1354_v32  ;;  %1360 = vmatmul.msk.bf16.vlgmr.msrb.gmra.mxu3 %vm57_vm2, %v1354_v32 }
 0x13f   :  { %v355_v57 = vpop.f32.mrf.mxu2  ;;  %v368_v58 = vpop.f32.mrf.mxu3 }
 0x140   :  { %v400_v59 = vadd.f32 %v355_v57, %v218_v30  ;;  %v401_v60 = vadd.f32 %v368_v58, %v231_v31  ;;  %v331_v61 = vpop.f32.mrf.mxu0  ;;  %v344_v62 = vpop.f32.mrf.mxu1 }
 0x147   :  { %v357_v63 = vpop.f32.mrf.mxu2  ;;  %v370_v1 = vpop.f32.mrf.mxu3 }
 0x148   :  { %v381_v2 = vpop.f32.mrf.mxu0  ;;  %v394_v3 = vpop.f32.mrf.mxu1 }
 0x149   :  { %v402_v5 = vadd.f32 %v381_v2, %v244_v41  ;;  %v403_v6 = vadd.f32 %v394_v3, %v257_v42 }
 0x14a   :  { %1362 = vmatmul.msk.bf16.vlgmr.msra.gmra.mxu0 %vm57_vm2, %v1361_v4  ;;  %1363 = vmatmul.msk.bf16.vlgmr.msra.gmra.mxu1 %vm57_vm2, %v1361_v4 }
 0x14c   :  { %1364 = vmatmul.msk.bf16.vlgmr.msra.gmra.mxu2 %vm57_vm2, %v1361_v4  ;;  %1365 = vmatmul.msk.bf16.vlgmr.msra.gmra.mxu3 %vm57_vm2, %v1361_v4 }
 0x14f   :  { %v473_v7 = vpop.f32.mrf.mxu2  ;;  %v486_v8 = vpop.f32.mrf.mxu3 }
 0x150   :  { %v542_v15 = vadd.f32 %v473_v7, %v398_v53  ;;  %v543_v16 = vadd.f32 %v486_v8, %v399_v54  ;;  %v383_v9 = vpop.f32.mrf.mxu0  ;;  %v396_v10 = vpop.f32.mrf.mxu1 }
 0x157   :  { %v475_v11 = vpop.f32.mrf.mxu2  ;;  %v488_v12 = vpop.f32.mrf.mxu3 }
 0x158   :  { %v499_v13 = vpop.f32.mrf.mxu0  ;;  %v512_v14 = vpop.f32.mrf.mxu1  ;;  %v1388_v11 = vmov 0.0  }
 0x159   :  { %v544_v17 = vadd.f32 %v499_v13, %v400_v59  ;;  %v545_v0 = vadd.f32 %v512_v14, %v401_v60  ;;  %16 = vst [vmem:[%s1671_s3 + $0x8] sm:$0xf] %v1388_v11 }
 0x15a   :  { %1366 = vmatmul.msk.bf16.vlgmr.msrb.gmra.mxu0 %vm57_vm2, %v1361_v4  ;;  %1367 = vmatmul.msk.bf16.vlgmr.msrb.gmra.mxu1 %vm57_vm2, %v1361_v4 }
 0x15f   :  { %v525_v18 = vpop.f32.mrf.mxu2  ;;  %v538_v19 = vpop.f32.mrf.mxu3 }
 0x160   :  { %v546_v20 = vadd.f32 %v525_v18, %v402_v5  ;;  %v547_v21 = vadd.f32 %v538_v19, %v403_v6  ;;  %v501_v22 = vpop.f32.mrf.mxu0  ;;  %v514_v23 = vpop.f32.mrf.mxu1 }
 0x167   :  { %v527_v24 = vpop.f32.mrf.mxu2  ;;  %v540_v25 = vpop.f32.mrf.mxu3 }
 0x168   :  { %v617_v26 = vpop.f32.mrf.mxu0  ;;  %v630_v27 = vpop.f32.mrf.mxu1 }
 0x169   :  { %v686_v28 = vadd.f32 %v617_v26, %v542_v15  ;;  %v687_v29 = vadd.f32 %v630_v27, %v543_v16 }
 0x16f   :  { %v643_v30 = vpop.f32.mrf.mxu2  ;;  %v656_v31 = vpop.f32.mrf.mxu3 }
 0x170   :  { %v688_v32 = vadd.f32 %v643_v30, %v544_v17  ;;  %v689_v33 = vadd.f32 %v656_v31, %v545_v0  ;;  %v619_v34 = vpop.f32.mrf.mxu0  ;;  %v632_v35 = vpop.f32.mrf.mxu1 }
 0x177   :  { %v645_v36 = vpop.f32.mrf.mxu2  ;;  %v658_v37 = vpop.f32.mrf.mxu3 }
 0x178   :  { %v669_v38 = vpop.f32.mrf.mxu0  ;;  %v682_v39 = vpop.f32.mrf.mxu1 }
 0x179   :  { %v690_v40 = vadd.f32 %v669_v38, %v546_v20  ;;  %v691_v41 = vadd.f32 %v682_v39, %v547_v21 }
 0x17f   :  { %v761_v42 = vpop.f32.mrf.mxu2  ;;  %v774_v43 = vpop.f32.mrf.mxu3 }
 0x180   :  { %v830_v44 = vadd.f32 %v761_v42, %v686_v28  ;;  %v831_v45 = vadd.f32 %v774_v43, %v687_v29  ;;  %v671_v46 = vpop.f32.mrf.mxu0  ;;  %v684_v47 = vpop.f32.mrf.mxu1 }
 0x187   :  { %v763_v48 = vpop.f32.mrf.mxu2  ;;  %v776_v49 = vpop.f32.mrf.mxu3 }
 0x188   :  { %v787_v50 = vpop.f32.mrf.mxu0  ;;  %v800_v51 = vpop.f32.mrf.mxu1 }
 0x189   :  { %v832_v52 = vadd.f32 %v787_v50, %v688_v32  ;;  %v833_v53 = vadd.f32 %v800_v51, %v689_v33 }
 0x18f   :  { %v813_v54 = vpop.f32.mrf.mxu2  ;;  %v826_v55 = vpop.f32.mrf.mxu3 }
 0x190   :  { %v834_v56 = vadd.f32 %v813_v54, %v690_v40  ;;  %v835_v57 = vadd.f32 %v826_v55, %v691_v41  ;;  %v789_v58 = vpop.f32.mrf.mxu0  ;;  %v802_v59 = vpop.f32.mrf.mxu1 }
 0x194   :  { %v1272_v23 = vpop.permute.xlu0 %1271 }
 0x197   :  { %v815_v60 = vpop.f32.mrf.mxu2  ;;  %v828_v61 = vpop.f32.mrf.mxu3 }
 0x198   :  { %v905_v62 = vpop.f32.mrf.mxu0  ;;  %v918_v63 = vpop.f32.mrf.mxu1 }
 0x199   :  { %v974_v21 = vadd.f32 %v905_v62, %v830_v44  ;;  %v975_v22 = vadd.f32 %v918_v63, %v831_v45 }
 0x19f   :  { %v931_v1 = vpop.f32.mrf.mxu2  ;;  %v944_v2 = vpop.f32.mrf.mxu3 }
 0x1a0   :  { %v907_v3 = vpop.f32.mrf.mxu0  ;;  %v920_v4 = vpop.f32.mrf.mxu1  ;;  %v976_v33 = vadd.f32 %v931_v1, %v832_v52  ;;  %v977_v34 = vadd.f32 %v944_v2, %v833_v53 }
 0x1a7   :  { %v933_v5 = vpop.f32.mrf.mxu2  ;;  %v946_v6 = vpop.f32.mrf.mxu3 }
 0x1a8   :  { %v957_v7 = vpop.f32.mrf.mxu0  ;;  %v970_v8 = vpop.f32.mrf.mxu1 }
 0x1a9   :  { %v978_v50 = vadd.f32 %v957_v7, %v834_v56  ;;  %v979_v51 = vadd.f32 %v970_v8, %v835_v57 }
 0x1af   :  { %v1049_v15 = vpop.f32.mrf.mxu2  ;;  %v1062_v16 = vpop.f32.mrf.mxu3 }
 0x1b0   :  { %v959_v9 = vpop.f32.mrf.mxu0  ;;  %v972_v10 = vpop.f32.mrf.mxu1  ;;  %v1118_v24 = vadd.f32 %v1049_v15, %v974_v21  ;;  %v1119_v25 = vadd.f32 %v1062_v16, %v975_v22 }
 0x1b7   :  { %v1051_v12 = vpop.f32.mrf.mxu2  ;;  %v1064_v13 = vpop.f32.mrf.mxu3 }
 0x1b8   :  { %v1075_v14 = vpop.f32.mrf.mxu0  ;;  %v1088_v17 = vpop.f32.mrf.mxu1 }
 0x1b9   :  { %v1120_v37 = vadd.f32 %v1075_v14, %v976_v33  ;;  %v1121_v38 = vadd.f32 %v1088_v17, %v977_v34 }
 0x1bf   :  { %v1101_v0 = vpop.f32.mrf.mxu2  ;;  %v1114_v18 = vpop.f32.mrf.mxu3 }
 0x1c0   :  { %v1077_v19 = vpop.f32.mrf.mxu0  ;;  %v1090_v20 = vpop.f32.mrf.mxu1  ;;  %v1122_v53 = vadd.f32 %v1101_v0, %v978_v50  ;;  %v1123_v54 = vadd.f32 %v1114_v18, %v979_v51 }
 0x1c7   :  { %v1103_v26 = vpop.f32.mrf.mxu2  ;;  %v1116_v27 = vpop.f32.mrf.mxu3 }
 0x1c8   :  { %v1193_v28 = vpop.f32.mrf.mxu0  ;;  %v1206_v29 = vpop.f32.mrf.mxu1 }
 0x1c9   :  { %v1262_v30 = vadd.f32 %v1193_v28, %v1118_v24  ;;  %v1263_v31 = vadd.f32 %v1206_v29, %v1119_v25 }
 0x1cb   :  { %v1275_v32 = vadd.f32 %v1272_v23, %v1263_v31  ;;  %v1274_v35 = vadd.f32 %v1272_v23, %v1262_v30 }
 0x1cd   :  { %v1286_v36 = vrot.slane %v1275_v32, 6 }
 0x1cf   :  { %v1219_v39 = vpop.f32.mrf.mxu2  ;;  %v1232_v40 = vpop.f32.mrf.mxu3  ;;  %v1290_v41 = vsel %vm61_vm1, %v1274_v35, %v1286_v36 }
 0x1d0   :  { %v1264_v42 = vadd.f32 %v1219_v39, %v1120_v37  ;;  %v1265_v43 = vadd.f32 %v1232_v40, %v1121_v38  ;;  %v1195_v44 = vpop.f32.mrf.mxu0  ;;  %v1208_v45 = vpop.f32.mrf.mxu1 }
 0x1d2   :  { %v1276_v46 = vadd.f32 %v1272_v23, %v1264_v42  ;;  %v1277_v47 = vadd.f32 %v1272_v23, %v1265_v43 }
 0x1d4   :  { %v1287_v48 = vrot.slane %v1276_v46, 4  ;;  %v1288_v49 = vrot.slane %v1277_v47, 2 }
 0x1d6   :  { %v1292_v52 = vsel %vm1291_vm10, %v1287_v48, %v1288_v49 }
 0x1d7   :  { %v1294_v55 = vsel %vm1293_vm11, %v1290_v41, %v1292_v52  ;;  %v1221_v58 = vpop.f32.mrf.mxu2  ;;  %v1234_v59 = vpop.f32.mrf.mxu3 }
 0x1d8   :  { %1298 = vst [vmem:[%s1671_s3] sm:$0xff] %v1294_v55  ;;  %v1245_v60 = vpop.f32.mrf.mxu0  ;;  %v1258_v61 = vpop.f32.mrf.mxu1 }
 0x1d9   :  { %v1266_v62 = vadd.f32 %v1245_v60, %v1122_v53  ;;  %v1267_v63 = vadd.f32 %v1258_v61, %v1123_v54 }
 0x1db   :  { %v1279_v1 = vadd.f32 %v1272_v23, %v1267_v63  ;;  %v1278_v2 = vadd.f32 %v1272_v23, %v1266_v62 }
 0x1dd   :  { %v1289_v3 = vrot.slane %v1279_v1, 6 }
 0x1df   :  { %v1295_v56 = vsel %vm61_vm1, %v1278_v2, %v1289_v3 }
 0x1e0   :  { %1301 = vst.msk [vmem:[%s1671_s3 + $0x8] sm:$0xf] %vm1300_vm13, %v1295_v56  ;;  %v1247_v57 = vpop.f32.mrf.mxu0  ;;  %v1260_v4 = vpop.f32.mrf.mxu1 }

</bundles_post_ra>
